<compile_context>
chip_gen: v7x
topology: tpu7x:2x2x1
jax: 0.10.0
libtpu: 0.0.40
codegen_flags: <defaults>
</compile_context>

<pallas_src>
import functools

import numpy as np
import jax
import jax.numpy as jnp
from jax.experimental import pallas as pl
from jax.experimental.pallas import tpu as pltpu

_LANE = 128
_EPS = 1e-07


def _cdiv(a, b):
    return (a + b - 1) // b


def _round_up(x, m):
    return ((x + m - 1) // m) * m


def _default_num_cores():
    """2 on megacore chips (v4 / v5p / v7x), else 1."""
    try:
        kind = jax.devices()[0].device_kind.lower()
    except Exception:
        return 1
    if ("v4" in kind) or ("v5p" in kind) or ("v7" in kind) or ("7x" in kind):
        return 2
    return 1


def _dice_partial_kernel(pred_ref, tgt_ref, out_ref, *, rows_chunk):
    """Accumulate per-class (intersection, softmax-sum, target-sum) partials.

    pred_ref: (1, C, rows_tile, 128) logits
    tgt_ref:  (1, 1, rows_tile, 128) int32 class ids (-1 = lane padding)
    out_ref:  (1, 3*C, rows_chunk, 128) f32 partial sums, resident across (b, i)
    """
    b = pl.program_id(1)
    i = pl.program_id(2)
    C = pred_ref.shape[1]
    rows_tile = pred_ref.shape[2]
    n_chunks = rows_tile // rows_chunk

    # First visit of this core's output block: zero the resident accumulator.
    @pl.when(jnp.logical_and(b == 0, i == 0))
    def _init():
        out_ref[...] = jnp.zeros_like(out_ref)

    # Loop-invariant class-index iota (hoisted: JAX does not CSE broadcasts).
    cls = jax.lax.broadcasted_iota(jnp.int32, (C, rows_chunk, _LANE), 0)

    def body(k, carry):
        acc_i, acc_p, acc_t = carry
        r0 = pl.multiple_of(k * rows_chunk, rows_chunk)
        logits = pred_ref[0, :, pl.ds(r0, rows_chunk), :].astype(jnp.float32)  # (C,R,128)
        tgt = tgt_ref[0, :, pl.ds(r0, rows_chunk), :]                          # (1,R,128)

        # Softmax over the class axis (axis 0): per-vreg VPU ops, since every
        # class slab is exactly one (8,128) vreg.
        m = jnp.max(logits, axis=0, keepdims=True)
        e = jnp.exp(logits - m)
        denom = jnp.sum(e, axis=0, keepdims=True)                              # (1,R,128)

        # Masked reciprocal row: one (1,R,128) divide replaces the (C,R,128)
        # divide + separate valid multiply (exact, to hold the f32 tolerance).
        valid = (tgt >= 0).astype(jnp.float32)
        inv = valid / denom
        pm = e * inv                                                           # masked probs

        onehot = (cls == tgt).astype(jnp.float32)   # padding (-1) -> all zeros
        return (acc_i + pm * onehot, acc_p + pm, acc_t + onehot)

    zero = jnp.zeros((C, rows_chunk, _LANE), jnp.float32)
    acc_i, acc_p, acc_t = jax.lax.fori_loop(0, n_chunks, body, (zero, zero, zero))

    # Single merged read-modify-write of the resident output block.
    out_ref[0] = out_ref[0] + jnp.concatenate([acc_i, acc_p, acc_t], axis=0)


def dice_loss(pred, target, *, tile_rows=256, rows_chunk=8, n_cores=None,
              vmem_input_budget=8 * 1024 * 1024):
    """pred: (B, C, *spatial) logits.  target: (B, *spatial) integer class ids."""
    B, C = int(pred.shape[0]), int(pred.shape[1])
    if C < 2:
        raise ValueError("DiceLoss needs at least 2 classes (background + 1).")
    N = int(np.prod(pred.shape[2:]))
    if n_cores is None:
        n_cores = _default_num_cores()

    # ---- tile selection (in rows of 128 lanes) -------------------------------
    rows_total = _cdiv(N, _LANE)
    itemsize = np.dtype(pred.dtype).itemsize
    per_row = 2 * _LANE * (C * itemsize + 4)          # double-buffered pred + int32 tgt
    cap_rows = max(rows_chunk,
                   (vmem_input_budget // per_row) // rows_chunk * rows_chunk)
    rows_tile = min(int(tile_rows), cap_rows)
    rows_tile = min(rows_tile, _round_up(_cdiv(rows_total, n_cores), rows_chunk))
    # Round DOWN to a chunk multiple so the VMEM cap is never overshot.
    rows_tile = max(rows_chunk, (rows_tile // rows_chunk) * rows_chunk)

    total_tiles = _cdiv(rows_total, rows_tile)
    tiles_per_core = _cdiv(total_tiles, n_cores)
    rows_pad = n_cores * tiles_per_core * rows_tile
    n_pad = rows_pad * _LANE

    pred3 = pred.reshape(B, C, N)                     # native layout: no transpose copy
    tgt3 = target.reshape(B, 1, N).astype(jnp.int32)
    if n_pad != N:
        # Padded logits are 0 (finite) and padded targets are -1, so the
        # in-kernel mask drops them exactly.
        pred3 = jnp.pad(pred3, ((0, 0), (0, 0), (0, n_pad - N)))
        tgt3 = jnp.pad(tgt3, ((0, 0), (0, 0), (0, n_pad - N)), constant_values=-1)
    pred4 = pred3.reshape(B, C, rows_pad, _LANE)
    tgt4 = tgt3.reshape(B, 1, rows_pad, _LANE)

    grid = (n_cores, B, tiles_per_core)
    kernel = functools.partial(_dice_partial_kernel, rows_chunk=rows_chunk)

    partials = pl.pallas_call(
        kernel,
        out_shape=jax.ShapeDtypeStruct((n_cores, 3 * C, rows_chunk, _LANE), jnp.float32),
        grid_spec=pltpu.PrefetchScalarGridSpec(
            num_scalar_prefetch=0,
            grid=grid,
            in_specs=[
                pl.BlockSpec((1, C, rows_tile, _LANE),
                             lambda c, b, i: (b, 0, c * tiles_per_core + i, 0)),
                pl.BlockSpec((1, 1, rows_tile, _LANE),
                             lambda c, b, i: (b, 0, c * tiles_per_core + i, 0)),
            ],
            out_specs=pl.BlockSpec((1, 3 * C, rows_chunk, _LANE),
                                   lambda c, b, i: (c, 0, 0, 0)),
        ),
        compiler_params=pltpu.CompilerParams(
            # Leading core axis is megacore-shardable; (b, i) are reduction axes.
            dimension_semantics=("parallel", "arbitrary", "arbitrary")),
    )(pred4, tgt4)

    # Tiny finalize in plain JAX: combine cores/rows/lanes, dice over classes 1..C-1.
    sums = partials.reshape(n_cores, 3, C, rows_chunk * _LANE).sum(axis=(0, 3))  # (3, C)
    inter, psum, tsum = sums[0], sums[1], sums[2]
    dice = (2.0 * inter[1:] + _EPS) / (psum[1:] + tsum[1:] + _EPS)
    return 1.0 - jnp.mean(dice)


def _ref_dice_loss(pred, target):
    """Pure-JAX reference mirroring the PyTorch module."""
    B, C = pred.shape[0], pred.shape[1]
    p = jax.nn.softmax(pred.astype(jnp.float32), axis=1).reshape(B, C, -1)
    t = target.reshape(B, -1)
    dices = []
    for c in range(1, C):
        pc = p[:, c, :]
        tc = (t == c).astype(jnp.float32)
        inter = jnp.sum(pc * tc)
        union = jnp.sum(pc) + jnp.sum(tc)
        dices.append((2.0 * inter + _EPS) / (union + _EPS))
    return 1.0 - jnp.mean(jnp.stack(dices))


if __name__ == "__main__":
    key = jax.random.PRNGKey(0)
    k1, k2 = jax.random.split(key)
    # Small 3-D volume consistent with the module's docstring shapes: (B, C, D, H, W) logits.
    pred = jax.random.normal(k1, (2, 5, 8, 8, 8), dtype=jnp.float32)
    target = jax.random.randint(k2, (2, 8, 8, 8), 0, 5, dtype=jnp.int32)

    loss = jax.block_until_ready(dice_loss(pred, target))
    ref = jax.block_until_ready(_ref_dice_loss(pred, target))
    assert np.allclose(np.asarray(loss), np.asarray(ref), atol=1e-5, rtol=1e-5), (loss, ref)
    print("KERNEL_OK")
</pallas_src>

<mosaic_0001>
module attributes {stable_mosaic.version = 11 : i64} {
  func.func @_dice_partial_kernel(%arg0: i32, %arg1: i32, %arg2: i32, %arg3: memref<1x5x8x128xf32, #tpu.memory_space<vmem>>, %arg4: memref<1x1x8x128xi32, #tpu.memory_space<vmem>>, %arg5: memref<1x15x8x128xf32, #tpu.memory_space<vmem>>) attributes {dimension_semantics = [#tpu.dimension_semantics<parallel>, #tpu.dimension_semantics<arbitrary>, #tpu.dimension_semantics<arbitrary>], iteration_bounds = array<i64: 1, 2, 1>, scalar_prefetch = 0 : i64, scratch_operands = 0 : i64, tpu.core_type = #tpu.core_type<tc>, window_params = [{transform_indices = @transform_0, window_bounds = array<i64: 1, 5, 8, 128>}, {transform_indices = @transform_1, window_bounds = array<i64: 1, 1, 8, 128>}, {transform_indices = @transform_2, window_bounds = array<i64: 1, 15, 8, 128>}]} {
    %c0_i32 = arith.constant 0 : i32
    %0 = arith.cmpi eq, %arg1, %c0_i32 : i32
    %c0_i32_0 = arith.constant 0 : i32
    %1 = arith.cmpi eq, %arg2, %c0_i32_0 : i32
    %2 = arith.andi %0, %1 : i1
    %3 = arith.extui %2 : i1 to i32
    %c0_i32_1 = arith.constant 0 : i32
    %4 = arith.cmpi ne, %3, %c0_i32_1 : i32
    scf.if %4 {
      %cst_19 = arith.constant 0.000000e+00 : f32
      %44 = vector.broadcast %cst_19 : f32 to vector<1x15x8x128xf32>
      %c0_20 = arith.constant 0 : index
      %c0_21 = arith.constant 0 : index
      %c0_22 = arith.constant 0 : index
      %c0_23 = arith.constant 0 : index
      %45 = vector.load %arg5[%c0_20, %c0_21, %c0_22, %c0_23] : memref<1x15x8x128xf32, #tpu.memory_space<vmem>>, vector<1x15x8x128xf32>
      tpu.vector_store %arg5[%c0_20, %c0_21, %c0_22, %c0_23], %44 {strides = array<i32>} : memref<1x15x8x128xf32, #tpu.memory_space<vmem>>, vector<1x15x8x128xf32>,
    } else {
    }
    %5 = tpu.iota {dimensions = array<i32: 0>} : vector<5x8x128xi32>
    %cst = arith.constant 0.000000e+00 : f32
    %6 = vector.broadcast %cst : f32 to vector<5x8x128xf32>
    %c0_i32_2 = arith.constant 0 : i32
    %c8_i32 = arith.constant 8 : i32
    %7 = arith.muli %c0_i32_2, %c8_i32 : i32
    %8 = tpu.assume_multiple %7, 8 : i32
    %c0 = arith.constant 0 : index
    %c0_3 = arith.constant 0 : index
    %9 = arith.index_cast %8 : i32 to index
    %c0_4 = arith.constant 0 : index
    %10 = vector.load %arg3[%c0, %c0_3, %9, %c0_4] : memref<1x5x8x128xf32, #tpu.memory_space<vmem>>, vector<1x5x8x128xf32>
    %11 = vector.shape_cast %10 : vector<1x5x8x128xf32> to vector<5x8x128xf32>
    %c0_5 = arith.constant 0 : index
    %c0_6 = arith.constant 0 : index
    %12 = arith.index_cast %8 : i32 to index
    %c0_7 = arith.constant 0 : index
    %13 = vector.load %arg4[%c0_5, %c0_6, %12, %c0_7] : memref<1x1x8x128xi32, #tpu.memory_space<vmem>>, vector<1x1x8x128xi32>
    %14 = vector.shape_cast %13 : vector<1x1x8x128xi32> to vector<1x8x128xi32>
    %cst_8 = arith.constant dense<0xFF800000> : vector<8x128xf32>
    %15 = vector.multi_reduction <maximumf>, %11, %cst_8 [0] : vector<5x8x128xf32> to vector<8x128xf32>
    %16 = vector.shape_cast %15 : vector<8x128xf32> to vector<1x8x128xf32>
    %17 = vector.broadcast %16 : vector<1x8x128xf32> to vector<5x8x128xf32>
    %18 = arith.subf %11, %17 : vector<5x8x128xf32>
    %19 = math.exp %18 : vector<5x8x128xf32>
    %cst_9 = arith.constant dense<0.000000e+00> : vector<8x128xf32>
    %20 = vector.multi_reduction <add>, %19, %cst_9 [0] : vector<5x8x128xf32> to vector<8x128xf32>
    %21 = vector.shape_cast %20 : vector<8x128xf32> to vector<1x8x128xf32>
    %c0_i32_10 = arith.constant 0 : i32
    %22 = vector.broadcast %c0_i32_10 : i32 to vector<1x8x128xi32>
    %23 = arith.cmpi sge, %14, %22 : vector<1x8x128xi32>
    %24 = arith.extui %23 : vector<1x8x128xi1> to vector<1x8x128xi32>
    %25 = arith.sitofp %24 : vector<1x8x128xi32> to vector<1x8x128xf32>
    %26 = arith.divf %25, %21 : vector<1x8x128xf32>
    %27 = vector.broadcast %26 : vector<1x8x128xf32> to vector<5x8x128xf32>
    %28 = arith.mulf %19, %27 : vector<5x8x128xf32>
    %29 = vector.broadcast %14 : vector<1x8x128xi32> to vector<5x8x128xi32>
    %30 = arith.cmpi eq, %5, %29 : vector<5x8x128xi32>
    %31 = arith.extui %30 : vector<5x8x128xi1> to vector<5x8x128xi32>
    %32 = arith.sitofp %31 : vector<5x8x128xi32> to vector<5x8x128xf32>
    %33 = arith.mulf %28, %32 : vector<5x8x128xf32>
    %34 = arith.addf %6, %33 : vector<5x8x128xf32>
    %35 = arith.addf %6, %28 : vector<5x8x128xf32>
    %36 = arith.addf %6, %32 : vector<5x8x128xf32>
    %c1_i32 = arith.constant 1 : i32
    %c0_11 = arith.constant 0 : index
    %c0_12 = arith.constant 0 : index
    %c0_13 = arith.constant 0 : index
    %c0_14 = arith.constant 0 : index
    %37 = vector.load %arg5[%c0_11, %c0_12, %c0_13, %c0_14] : memref<1x15x8x128xf32, #tpu.memory_space<vmem>>, vector<1x15x8x128xf32>
    %38 = vector.shape_cast %37 : vector<1x15x8x128xf32> to vector<15x8x128xf32>
    %39 = tpu.concatenate %34, %35, %36 in 0 : vector<5x8x128xf32>, vector<5x8x128xf32>, vector<5x8x128xf32> -> vector<15x8x128xf32>
    %40 = arith.addf %38, %39 : vector<15x8x128xf32>
    %c0_15 = arith.constant 0 : index
    %c0_16 = arith.constant 0 : index
    %c0_17 = arith.constant 0 : index
    %c0_18 = arith.constant 0 : index
    %41 = vector.load %arg5[%c0_15, %c0_16, %c0_17, %c0_18] : memref<1x15x8x128xf32, #tpu.memory_space<vmem>>, vector<1x15x8x128xf32>
    %42 = vector.shape_cast %41 : vector<1x15x8x128xf32> to vector<15x8x128xf32>
    %43 = vector.shape_cast %40 : vector<15x8x128xf32> to vector<1x15x8x128xf32>
    tpu.vector_store %arg5[%c0_15, %c0_16, %c0_17, %c0_18], %43 {strides = array<i32>} : memref<1x15x8x128xf32, #tpu.memory_space<vmem>>, vector<1x15x8x128xf32>,
    return
  }
  func.func @transform_0(%arg0: i32, %arg1: i32, %arg2: i32) -> (i32, i32, i32, i32) {
    %c1_i32 = arith.constant 1 : i32
    %0 = arith.muli %arg0, %c1_i32 : i32
    %1 = arith.addi %0, %arg2 : i32
    %c0_i32 = arith.constant 0 : i32
    %c0_i32_0 = arith.constant 0 : i32
    %c0_i32_1 = arith.constant 0 : i32
    return %arg1, %c0_i32, %1, %c0_i32_0 : i32, i32, i32, i32
  }
  func.func @transform_1(%arg0: i32, %arg1: i32, %arg2: i32) -> (i32, i32, i32, i32) {
    %c1_i32 = arith.constant 1 : i32
    %0 = arith.muli %arg0, %c1_i32 : i32
    %1 = arith.addi %0, %arg2 : i32
    %c0_i32 = arith.constant 0 : i32
    %c0_i32_0 = arith.constant 0 : i32
    %c0_i32_1 = arith.constant 0 : i32
    return %arg1, %c0_i32, %1, %c0_i32_0 : i32, i32, i32, i32
  }
  func.func @transform_2(%arg0: i32, %arg1: i32, %arg2: i32) -> (i32, i32, i32, i32) {
    %c0_i32 = arith.constant 0 : i32
    %c0_i32_0 = arith.constant 0 : i32
    %c0_i32_1 = arith.constant 0 : i32
    %c0_i32_2 = arith.constant 0 : i32
    return %arg0, %c0_i32, %c0_i32_0, %c0_i32_1 : i32, i32, i32, i32
  }
}

</mosaic_0001>

<bundles_post_ra>
// kernel: tpu_custom_call.1
= control target key start
LH: loop header
LB: loop body
LE: loop exit
PB: predicated region body
PF: predicated region fallthrough
CT: control target
= control target key end

     0   :  { %7 = vsyncpa [#allocation3], 0  ;;  %s953_s0 = inlined_call_operand.hbm [shape: f32[2,5,8,128], index: 0, kind: input, shape index: {}]   ;;  %s954_s1 = inlined_call_operand.hbm [shape: s32[2,1,8,128], index: 1, kind: input, shape index: {}]   ;;  %s955_s2 = inlined_call_operand.hbm [shape: f32[1,15,8,128], index: 2, kind: output, shape index: {}]  }
   0x1   :  { %9 = vsyncpa [#allocation3 + $0x1], 0 }
   0x2   :  { %10 = vsyncpa [#allocation6], 0 }
   0x3   :  { %12 = vsyncpa [#allocation6 + $0x1], 0 }
   0x4   :  { %13 = vsyncpa [#allocation4], 0  ;;  %s747_s9 = smov 0   ;;  %s749_s10 = smov 0  }
   0x5   :  { %s751_s11 = smov 0   ;;  %s753_s12 = smov 0  }
   0x6   :  { %s755_s13 = smov 0   ;;  %s757_s14 = smov 0  }
   0x7 LB: > { %s469_s15 = sadd.s32 4294967295, %s721_s14   ;;  %s34_s16 = sadd.s32 1, %s717_s13  ;;  %s721_s14 = sphi %s757_s14, %s19_s14   ;;  %s717_s13 = sphi %s755_s13, %s967_s13   ;;  %s713_s12 = sphi %s753_s12, %s966_s12   ;;  %s709_s11 = sphi %s751_s11, %s965_s11   ;;  %s705_s10 = sphi %s749_s10, %s964_s10   ;;  %s701_s9 = sphi %s747_s9, %s963_s9  }
   0x8   : > { %p36_p0 = scmp.ge.s32.totalorder %s34_s16, 2  ;;  %s49_s17 = sadd.s32 1, %s709_s11 }
   0x9   : > { %p56_p1 = scmp.ne.s32.totalorder %s709_s11, %s705_s10  ;;  %p57_p2 = scmp.eq.s32.totalorder %s721_s14, 0 }
   0xa   : > { %s969_s16 = smov (%p36_p0, %s34_s16), 0  ;;  %p62_p4 = scmp.ne.s32.totalorder %s705_s10, %s701_s9 }
   0xb   : > { %p58_p3 = por %p57_p2, %p56_p1  ;;  %s44_s18 = ssub.s32 %s717_s13, %s969_s16 }
   0xc   : > { %p63_p5 = scmp.eq.s32.totalorder %s469_s15, 0  ;;  %p47_p6 = scmp.eq.s32.totalorder %s44_s18, 0 }
   0xd   : > { %p507_p8 = scmp.lt.s32.totalorder %s721_s14, 2  ;;  %s797_s21 = sand.u32 1, %s709_s11  }
   0xe   : > { %p788_p7 = por %p63_p5, %p62_p4  ;;  %s490_s22 = smul.u32 640, %s717_s13 }
   0xf   : > { %s794_s20 = scalar_select %p47_p6, %s709_s11, %s49_s17  }
  0x10   : > { %s957_s19 = scalar_select %p788_p7, 1, 0 }
  0x11   : > { %s489_s23 = smul.u32 40, %s797_s21  ;;  %s804_s26 = scalar_lea.hbm %s953_s0, %s490_s22 }
  0x12   : > { %p806_p9 = pnand %p507_p8, %p58_p3  ;;  %s143_s30 = scalar_lea.sflag [#allocation3], %s797_s21 }
  0x13   : > { %s146_s28 = scalar_lea.vmem [#allocation2], %s489_s23  ;;  %s577_s3 = scalar_lea.hbm %s804_s26, 640 }
  0x14   : > { %s155_s29 = sshll.u32 %s146_s28, 4  ;;  %p578_p10 = scmp.ne.s32.totalorder %s804_s26, %s577_s3  ;;  %s810_s29 = int_to_ptr.vmem [resolvable:$true] %s155_s29 }
  0x15   : > { %p579_p11 = pneg %p806_p9  ;;  %s582_s6 = scalar_lea.hbm %s953_s0, 1280 }
  0x16   : > { %p583_p0 = scmp.lt.u32.totalorder %s804_s26, %s953_s0  ;;  %p584_p1 = scmp.lt.u32.totalorder %s582_s6, %s577_s3 }
  0x17   : > { %p580_p12 = pnand %p579_p11, %p578_p10  ;;  %p586_p3 = scmp.lt.u32.totalorder %s577_s3, %s804_s26 }
  0x18   : > { %p585_p2 = por %p584_p1, %p583_p0 }
  0x19   : > { %p581_p13 = pneg %p580_p12 }
  0x1a   : > { %p587_p4 = por %p586_p3, %p585_p2 }
  0x1c   : > { %p588_p5 = pnand %p587_p4, %p581_p13 }
  0x1e   : > { %591 = shalt.err (!%p588_p5)
}
  0x1f   : > { %s592_s9 = scalar_lea.vmem %s810_s29, 640  ;;  %s723_s17 = smov [#allocation2]  }
  0x20   : > { %p593_p6 = scmp.ne.s32.totalorder %s810_s29, %s592_s9  ;;  %s597_s18 = sshll.u32 %s723_s17, 4  ;;  %s598_s18 = int_to_ptr.vmem [resolvable:$false] %s597_s18 }
  0x21   : > { %s599_s22 = scalar_lea.vmem %s598_s18, 1280  ;;  %p600_p12 = scmp.lt.s32.totalorder %s810_s29, %s598_s18 }
  0x22   : > { %p595_p8 = pnand %p593_p6, %p579_p11  ;;  %p601_p0 = scmp.lt.s32.totalorder %s599_s22, %s592_s9 }
  0x24   : > { %p596_p10 = pneg %p595_p8  ;;  %p602_p1 = por %p601_p0, %p600_p12 }
  0x26   : > { %p603_p2 = pnand %p602_p1, %p596_p10 }
  0x28   : > { %606 = shalt.err (!%p603_p2)
}
  0x29   : > { %s724_s23 = smov 128   ;;  %s725_s24 = smov 8  }
  0x2a   : > { %503 = dma.hbm_to_vmem [thread:$0]  (!%p806_p9), %s804_s26, 640, %s810_s29, %s143_s30, %s724_s23, %s724_s23, %s725_s24  }
  0x2b   : > { %p475_p13 = scmp.ge.s32.totalorder %s721_s14, 1  ;;  %p183_p3 = scmp.lt.s32.totalorder %s721_s14, 3 }
  0x2c   : > { %s473_s25 = sshll.u32 %s797_s21, 3  ;;  %s474_s3 = sshll.u32 %s717_s13, 7 }
  0x2d   : > { %p843_p4 = pnand %p475_p13, %p183_p3  ;;  %s169_s4 = scalar_lea.vmem [#allocation5], %s473_s25 }
  0x2e   : > { %s178_s5 = sshll.u32 %s169_s4, 4  ;;  %s851_s8 = scalar_lea.hbm %s954_s1, %s474_s3  ;;  %s179_s5 = int_to_ptr.vmem [resolvable:$true] %s178_s5 }
  0x2f   : > { %s959_s28 = scalar_select %p843_p4, 1, 0 }
  0x30   : > { %s166_s26 = scalar_lea.sflag [#allocation6], %s797_s21  ;;  %s607_s29 = scalar_lea.hbm %s851_s8, 128 }
  0x31   : > { %p608_p5 = scmp.ne.s32.totalorder %s851_s8, %s607_s29  ;;  %s612_s17 = scalar_lea.hbm %s954_s1, 256 }
  0x32   : > { %p613_p10 = scmp.lt.u32.totalorder %s851_s8, %s954_s1  ;;  %p614_p12 = scmp.lt.u32.totalorder %s612_s17, %s607_s29 }
  0x33   : > { %p610_p6 = pnand %p608_p5, %p579_p11  ;;  %p616_p1 = scmp.lt.u32.totalorder %s607_s29, %s851_s8 }
  0x34   : > { %p615_p0 = por %p614_p12, %p613_p10 }
  0x35   : > { %p611_p8 = pneg %p610_p6 }
  0x36   : > { %p617_p2 = por %p616_p1, %p615_p0 }
  0x38   : > { %p618_p13 = pnand %p617_p2, %p611_p8 }
  0x3a   : > { %621 = shalt.err (!%p618_p13)
}
  0x3b   : > { %s622_s21 = scalar_lea.vmem %s179_s5, 128  ;;  %s726_s23 = smov [#allocation5]  }
  0x3c   : > { %p623_p3 = scmp.ne.s32.totalorder %s179_s5, %s622_s21  ;;  %s627_s24 = sshll.u32 %s726_s23, 4  ;;  %s628_s24 = int_to_ptr.vmem [resolvable:$false] %s627_s24 }
  0x3d   : > { %s629_s25 = scalar_lea.vmem %s628_s24, 256  ;;  %p630_p7 = scmp.lt.s32.totalorder %s179_s5, %s628_s24 }
  0x3e   : > { %p625_p5 = pnand %p623_p3, %p579_p11  ;;  %p631_p4 = scmp.lt.s32.totalorder %s629_s25, %s622_s21 }
  0x40   : > { %p626_p6 = pneg %p625_p5  ;;  %p632_p10 = por %p631_p4, %p630_p7 }
  0x42   : > { %p633_p12 = pnand %p632_p10, %p626_p6 }
  0x44   : > { %636 = shalt.err (!%p633_p12)
}
  0x45   : > { %506 = dma.hbm_to_vmem [thread:$0]  (!%p806_p9), %s851_s8, 128, %s179_s5, %s166_s26  }
  0x46   : > { %p960_p8 = scmp.ne.s32.totalorder %s959_s28, 0 }
  0x47   : > { %s189_s3 = sand.u32 (!%p960_p8), 1, %s705_s10   ;;  %p961_p11 = scmp.ne.s32.totalorder (!%p960_p8), %s957_s19, 0 }
  0x48   : > { %187 = sbr.rel (%p960_p8) target bundleno = 163 (0xa3), region = 28  ;;  %s190_s6 = scalar_lea.sflag (!%p960_p8), [#allocation3], %s189_s3 }
  0x49   : > { %s491_s4 = smul.u32 (!%p960_p8), 40, %s189_s3 }
  0x4b   : > { %s876_s7 = scalar_lea.vmem (!%p960_p8), [#allocation2], %s491_s4 }
  0x4f   : > { %688 = dma.done.wait (%p961_p11), %s190_s6, 640  }
  0x50   : > { %690 = vsyncadd (%p961_p11), %s190_s6, 4294966656  ;;  %s476_s29 = sshll.u32 %s189_s3, 3  ;;  %s199_s27 = scalar_lea.sflag [#allocation6], %s189_s3 }
  0x51   : > { %s202_s30 = scalar_lea.vmem [#allocation5], %s476_s29 }
  0x52   : > { %692 = dma.done.wait (%p961_p11), %s199_s27, 128  }
  0x53   : > { %694 = vsyncadd (%p961_p11), %s199_s27, 4294967168  ;;  %p225_p7 = scmp.eq.s32.totalorder %s713_s12, 0 }
  0x54   : > { %v727_v0 = vmov (%p225_p7), 0.0  }
  0x55   : > { %230 = sbr.rel (!%p225_p7) target bundleno = 93 (0x5d), region = 40  ;;  %231 = vst [vmem:[#allocation7] sm:$0xff] (%p225_p7), %v727_v0  ;;  %232 = vst [vmem:[#allocation7 + $0x8] sm:$0xff] (%p225_p7), %v727_v0 }
  0x56   : > { %233 = vst [vmem:[#allocation7 + $0x10] sm:$0xff] (%p225_p7), %v727_v0  ;;  %234 = vst [vmem:[#allocation7 + $0x18] sm:$0xff] (%p225_p7), %v727_v0 }
  0x57   : > { %235 = vst [vmem:[#allocation7 + $0x20] sm:$0xff] (%p225_p7), %v727_v0  ;;  %236 = vst [vmem:[#allocation7 + $0x28] sm:$0xff] (%p225_p7), %v727_v0 }
  0x58   : > { %237 = vst [vmem:[#allocation7 + $0x30] sm:$0xff] (%p225_p7), %v727_v0  ;;  %238 = vst [vmem:[#allocation7 + $0x38] sm:$0xff] (%p225_p7), %v727_v0 }
  0x59   : > { %239 = vst [vmem:[#allocation7 + $0x40] sm:$0xff] (%p225_p7), %v727_v0  ;;  %240 = vst [vmem:[#allocation7 + $0x48] sm:$0xff] (%p225_p7), %v727_v0 }
  0x5a   : > { %241 = vst [vmem:[#allocation7 + $0x50] sm:$0xff] (%p225_p7), %v727_v0  ;;  %242 = vst [vmem:[#allocation7 + $0x58] sm:$0xff] (%p225_p7), %v727_v0 }
  0x5b   : > { %243 = vst [vmem:[#allocation7 + $0x60] sm:$0xff] (%p225_p7), %v727_v0  ;;  %244 = vst [vmem:[#allocation7 + $0x68] sm:$0xff] (%p225_p7), %v727_v0 }
  0x5c   : > { %245 = vst [vmem:[#allocation7 + $0x70] sm:$0xff] %v727_v0 }
  0x5d PF: > { %v246_v1 = vld [vmem:[%s876_s7] sm:$0xff]  ;;  %v247_v2 = vld [vmem:[%s876_s7 + $0x8] sm:$0xff]  ;;  %v248_v3 = vld [vmem:[%s876_s7 + $0x10] sm:$0xff]  ;;  %v728_v10 = vmov 0.0   ;;  %s729_s12 = smov [#allocation7]   ;;  %p902_p9 = scmp.eq.s32.totalorder %s469_s15, 1 }
  0x5e   : > { %v249_v4 = vld [vmem:[%s876_s7 + $0x18] sm:$0xff]  ;;  %v250_v5 = vld [vmem:[%s876_s7 + $0x20] sm:$0xff]  ;;  %v251_v6 = vld [vmem:[%s202_s30] sm:$0xff]  ;;  %s374_s19 = sshll.u32 %s729_s12, 4  ;;  %s906_s19 = int_to_ptr.vmem [resolvable:$true] %s374_s19 }
  0x5f   : > { %v252_v7 = vmax.f32 %v246_v1, %v250_v5  ;;  %v254_v8 = vmax.f32 %v248_v3, %v249_v4  ;;  %vm285_vm0 = vcmp.eq.s32.totalorder %v251_v6, 0  ;;  %vm286_vm1 = vcmp.eq.s32.totalorder %v251_v6, 1  ;;  %v320_v49 = vld [vmem:[#allocation7] sm:$0xff]  ;;  %v325_v54 = vld [vmem:[#allocation7 + $0x28] sm:$0xff]  ;;  %v322_v58 = vld [vmem:[#allocation7 + $0x10] sm:$0xff]  ;;  %s637_s15 = scalar_lea.vmem %s906_s19, 1920  ;;  %p644_p2 = scmp.lt.s32.totalorder %s906_s19, %s906_s19 }
  0x60   : > { %vm287_vm2 = vcmp.eq.s32.totalorder %v251_v6, 2  ;;  %vm288_vm3 = vcmp.eq.s32.totalorder %v251_v6, 3  ;;  %v892_v11 = vsel %vm285_vm0, 1.0, %v728_v10  ;;  %v894_v12 = vsel %vm286_vm1, 1.0, %v728_v10  ;;  %v326_v55 = vld [vmem:[#allocation7 + $0x30] sm:$0xff]  ;;  %v327_v56 = vld [vmem:[#allocation7 + $0x38] sm:$0xff]  ;;  %p638_p4 = scmp.ne.s32.totalorder %s906_s19, %s637_s15  ;;  %p645_p13 = scmp.lt.s32.totalorder %s637_s15, %s637_s15 }
  0x61   : > { %v253_v9 = vmax.f32 %v252_v7, %v247_v2  ;;  %vm289_vm4 = vcmp.eq.s32.totalorder %v251_v6, 4  ;;  %v481_v15 = vsel %vm287_vm2, 1.0, %v728_v10  ;;  %v482_v16 = vsel %vm288_vm3, 1.0, %v728_v10  ;;  %v321_v57 = vld [vmem:[#allocation7 + $0x8] sm:$0xff]  ;;  %v323_v59 = vld [vmem:[#allocation7 + $0x18] sm:$0xff] }
  0x62   : > { %v330_v13 = vld [vmem:[#allocation7 + $0x50] sm:$0xff]  ;;  %v331_v18 = vld [vmem:[#allocation7 + $0x58] sm:$0xff]  ;;  %v483_v21 = vsel %vm289_vm4, 1.0, %v728_v10  ;;  %vm275_vm5 = vcmp.ge.s32.totalorder %v251_v6, 0  ;;  %p639_p0 = pnand %p638_p4, %p902_p9  ;;  %p646_p3 = por %p645_p13, %p644_p2 }
  0x63   : > { %v255_v14 = vmax.f32 %v253_v9, %v254_v8  ;;  %v345_v17 = vadd.f32 %v892_v11, %v330_v13  ;;  %v332_v19 = vld [vmem:[#allocation7 + $0x60] sm:$0xff]  ;;  %v333_v20 = vld [vmem:[#allocation7 + $0x68] sm:$0xff]  ;;  %v346_v22 = vadd.f32 %v894_v12, %v331_v18  ;;  %v334_v25 = vld [vmem:[#allocation7 + $0x70] sm:$0xff]  ;;  %v478_v46 = vsel %vm275_vm5, 1.0, %v728_v10 }
  0x64   : > { %v347_v23 = vadd.f32 %v481_v15, %v332_v19  ;;  %v348_v24 = vadd.f32 %v482_v16, %v333_v20  ;;  %v349_v31 = vadd.f32 %v483_v21, %v334_v25  ;;  %p640_p1 = pneg %p639_p0 }
  0x65   : > { %v256_v26 = vsub.f32 %v246_v1, %v255_v14  ;;  %v257_v27 = vsub.f32 %v247_v2, %v255_v14  ;;  %v258_v28 = vsub.f32 %v248_v3, %v255_v14  ;;  %v259_v29 = vsub.f32 %v249_v4, %v255_v14  ;;  %360 = vst [vmem:[#allocation7 + $0x50] sm:$0xff] %v345_v17  ;;  %v324_v1 = vld [vmem:[#allocation7 + $0x20] sm:$0xff]  ;;  %v329_v3 = vld [vmem:[#allocation7 + $0x48] sm:$0xff] }
  0x66   : > { %v260_v30 = vsub.f32 %v250_v5, %v255_v14  ;;  %361 = vst [vmem:[#allocation7 + $0x58] sm:$0xff] %v346_v22  ;;  %362 = vst [vmem:[#allocation7 + $0x60] sm:$0xff] %v347_v23  ;;  %v328_v2 = vld [vmem:[#allocation7 + $0x40] sm:$0xff]  ;;  %p647_p5 = pnand %p646_p3, %p640_p1 }
  0x67   : > { %363 = vst [vmem:[#allocation7 + $0x68] sm:$0xff] %v348_v24  ;;  %v261_v32 = vmul.f32 1.442695, %v256_v26  ;;  %v263_v33 = vmul.f32 1.442695, %v257_v27  ;;  %364 = vst [vmem:[#allocation7 + $0x70] sm:$0xff] %v349_v31 }
  0x68   : > { %v265_v34 = vmul.f32 1.442695, %v258_v28  ;;  %v267_v35 = vmul.f32 1.442695, %v259_v29  ;;  %v269_v36 = vmul.f32 1.442695, %v260_v30 }
  0x69   : > { %565 = vpow2.f32 %v261_v32 }
  0x6a   : > { %567 = vpow2.f32 %v263_v33 }
  0x6b   : > { %569 = vpow2.f32 %v265_v34 }
  0x6c   : > { %571 = vpow2.f32 %v267_v35 }
  0x6d   : > { %573 = vpow2.f32 %v269_v36 }
  0x73   : > { %v566_v37 = vpop.eup %565 }
  0x74   : > { %v568_v38 = vpop.eup %567 }
  0x75   : > { %v570_v39 = vpop.eup %569  ;;  %v271_v40 = vadd.f32 %v568_v38, %v566_v37 }
  0x76   : > { %v572_v41 = vpop.eup %571 }
  0x77   : > { %v272_v42 = vadd.f32 %v570_v39, %v271_v40  ;;  %v574_v43 = vpop.eup %573 }
  0x79   : > { %v273_v44 = vadd.f32 %v572_v41, %v272_v42 }
  0x7b   : > { %v274_v45 = vadd.f32 %v574_v43, %v273_v44 }
  0x7d   : > { %575 = vrcp.f32 %v274_v45 }
  0x87   : > { %v576_v47 = vpop.eup %575 }
  0x88   : > { %v279_v48 = vmul.f32 %v576_v47, %v478_v46 }
  0x8a   : > { %v280_v50 = vmul.f32 %v566_v37, %v279_v48  ;;  %v281_v51 = vmul.f32 %v568_v38, %v279_v48  ;;  %v282_v52 = vmul.f32 %v570_v39, %v279_v48  ;;  %v283_v53 = vmul.f32 %v572_v41, %v279_v48 }
  0x8b   : > { %v284_v60 = vmul.f32 %v574_v43, %v279_v48 }
  0x8c   : > { %v300_v61 = vmul.f32 %v892_v11, %v280_v50  ;;  %v301_v62 = vmul.f32 %v894_v12, %v281_v51  ;;  %v302_v63 = vmul.f32 %v481_v15, %v282_v52  ;;  %v303_v0 = vmul.f32 %v482_v16, %v283_v53 }
  0x8d   : > { %v304_v4 = vmul.f32 %v483_v21, %v284_v60  ;;  %v340_v5 = vadd.f32 %v325_v54, %v280_v50  ;;  %v341_v6 = vadd.f32 %v326_v55, %v281_v51  ;;  %v342_v7 = vadd.f32 %v327_v56, %v282_v52 }
  0x8e   : > { %v335_v8 = vadd.f32 %v320_v49, %v300_v61  ;;  %v336_v9 = vadd.f32 %v321_v57, %v301_v62  ;;  %v337_v10 = vadd.f32 %v322_v58, %v302_v63  ;;  %v338_v13 = vadd.f32 %v323_v59, %v303_v0 }
  0x8f   : > { %v339_v11 = vadd.f32 %v324_v1, %v304_v4  ;;  %355 = vst [vmem:[#allocation7 + $0x28] sm:$0xff] %v340_v5  ;;  %356 = vst [vmem:[#allocation7 + $0x30] sm:$0xff] %v341_v6  ;;  %v343_v12 = vadd.f32 %v328_v2, %v283_v53  ;;  %v344_v14 = vadd.f32 %v329_v3, %v284_v60 }
  0x90   : > { %357 = vst [vmem:[#allocation7 + $0x38] sm:$0xff] %v342_v7  ;;  %350 = vst [vmem:[#allocation7] sm:$0xff] %v335_v8 }
  0x91   : > { %351 = vst [vmem:[#allocation7 + $0x8] sm:$0xff] %v336_v9  ;;  %352 = vst [vmem:[#allocation7 + $0x10] sm:$0xff] %v337_v10 }
  0x92   : > { %353 = vst [vmem:[#allocation7 + $0x18] sm:$0xff] %v338_v13  ;;  %354 = vst [vmem:[#allocation7 + $0x20] sm:$0xff] %v339_v11 }
  0x93   : > { %358 = vst [vmem:[#allocation7 + $0x40] sm:$0xff] %v343_v12  ;;  %359 = vst [vmem:[#allocation7 + $0x48] sm:$0xff] %v344_v14 }
  0x94   : > { %650 = shalt.err (!%p647_p5)
}
  0x95   : > { %s651_s26 = scalar_lea.hbm %s955_s2, 1920 }
  0x96   : > { %p652_p6 = scmp.ne.s32.totalorder %s955_s2, %s651_s26  ;;  %p657_p8 = scmp.lt.u32.totalorder %s651_s26, %s955_s2 }
  0x98   : > { %p653_p10 = pnand %p652_p6, %p902_p9 }
  0x9a   : > { %p654_p12 = pneg %p653_p10 }
  0x9c   : > { %p659_p11 = pnand %p657_p8, %p654_p12 }
  0x9e   : > { %662 = shalt.err (!%p659_p11)
}
  0x9f   : > { %s730_s21 = smov 128   ;;  %s731_s23 = smov 8  }
  0xa0   : > { %497 = dma.vmem_to_hbm [thread:$0]  (%p902_p9), %s906_s19, 1920, %s955_s2, [#allocation4], %s730_s21, %s730_s21, %s731_s23  }
  0xa1   : > { %696 = dma.done.wait (%p902_p9), [#allocation4], 1920  }
  0xa2   : > { %698 = vsyncadd (%p902_p9), [#allocation4], 4294965376 }
  0xa3 PF: > { %s19_s14 = sadd.s32 1, %s721_s14   ;;  %s963_s9 = smov %s705_s10 }
  0xa4   : > { %p16_p7 = scmp.ge.s32.totalorder %s19_s14, 4   ;;  %s964_s10 = smov %s709_s11 }
  0xa5   : > { %s965_s11 = smov %s794_s20  ;;  %s966_s12 = smov %s717_s13 }
  0xa6   : > { %s967_s13 = smov %s969_s16  ;;  %18 = sbr.rel (!%p16_p7) target bundleno = 7 (0x7), region = 83 }
  0xad   :  { %390 = vsyncpa [#allocation3], 1 }
  0xae   :  { %392 = vsyncpa [#allocation3 + $0x1], 1 }
  0xaf   :  { %393 = vsyncpa [#allocation6], 1 }
  0xb0   :  { %395 = vsyncpa [#allocation6 + $0x1], 1 }
  0xb1   :  { %396 = vsyncpa [#allocation4], 1 }
  0xb2   :  { %398 = vsyncpa [#allocation4 + $0x1], 1 }

</bundles_post_ra>
